<compile_context>
chip_gen: v6e
topology: v6e:2x2x1
jax: 0.10.0
libtpu: 0.0.40
codegen_flags: <defaults>
</compile_context>

<pallas_src>
import re

import jax
import jax.numpy as jnp
import numpy as np
from jax.experimental import pallas as pl
from jax.experimental.pallas import tpu as pltpu

_LANE = 128  # TPU lane width: K tiles are multiples of this


def _round_up(v: int, m: int) -> int:
    return ((v + m - 1) // m) * m


def _vmem_capacity_bytes() -> int:
    """Per-core VMEM capacity; conservative (v7x, 64 MiB) fallback on failure."""
    try:
        return int(pltpu.get_tpu_info().vmem_capacity_bytes)
    except Exception:
        return 64 * 1024 * 1024


def _tpu_generation() -> int:
    try:
        kind = jax.devices()[0].device_kind  # e.g. "TPU v5e", "TPU v6e", "TPU7x"
        m = re.search(r"(\d+)", kind)
        return int(m.group(1)) if m else 0
    except Exception:
        return 0


def _compute_block(bh, b, y, x_ref, err_ref):
    """x = BH @ y ; err = y - B @ x   for one K tile (all operands in VMEM)."""
    cdtype = b.dtype
    y_c = y if y.dtype == cdtype else y.astype(cdtype)
    # Analysis matmul (MXU, f32 accumulation).
    x_f32 = jnp.dot(bh, y_c, preferred_element_type=jnp.float32)
    # Single cast of the analysis result, reused for both the store and the
    # synthesis matmul (review: no double (N, tk) cast pass).
    x_c = x_f32 if cdtype == jnp.float32 else x_f32.astype(cdtype)
    x_ref[...] = x_c if x_ref.dtype == cdtype else x_f32.astype(x_ref.dtype)
    # Synthesis matmul + residual (matches torch exactly when cdtype == y.dtype).
    recon = jnp.dot(b, x_c, preferred_element_type=jnp.float32)
    err_ref[...] = (y.astype(jnp.float32) - recon).astype(err_ref.dtype)


def _agrid_h_kernel(bh_ref, b_ref, y_ref, x_ref, err_ref):
    _compute_block(bh_ref[...], b_ref[...], y_ref[...], x_ref, err_ref)


def _agrid_h_kernel_shared(b_ref, y_ref, x_ref, err_ref):
    b = b_ref[...]
    # BH is exactly B^T: ship only B (halves resident weight VMEM / weight DMA).
    # TODO(synk): replace the per-step XLU transpose with a transposed-lhs
    # lax.dot_general (or a one-shot scratch transpose) once guaranteed by the
    # deployed Mosaic version; on this memory-bound kernel the XLU work is
    # normally hidden under the y/x/err HBM stream.
    _compute_block(b.T, b, y_ref[...], x_ref, err_ref)


def agrid_h(B, BH, y, *, tk=None, compute_dtype="auto", bh_is_transpose=False):
    """Pallas implementation of AgridH.forward(y) -> (x, err).

    Args:
      B:  (M, N) synthesis operator.
      BH: (N, M) analysis operator (may be None when bh_is_transpose=True).
      y:  (M, K) input signal(s); K columns are processed in lane-dense tiles.
      tk: optional K tile size (rounded to a multiple of 128).
      compute_dtype: matmul operand dtype. "auto" keeps y.dtype, switching to
        bfloat16 operands (f32 accumulation) only for large f32 operators on
        v6e/v7x; pass None or a dtype to force. Outputs always keep y.dtype.
      bh_is_transpose: if True, BH is assumed to be exactly B^T and only B is
        shipped to the kernel.
    """
    M, N = B.shape
    if not bh_is_transpose:
        if BH is None or BH.shape != (N, M):
            raise ValueError(f"BH must have shape {(N, M)}")
    if y.ndim != 2 or y.shape[0] != M:
        raise ValueError(f"y must have shape ({M}, K), got {y.shape}")
    K = y.shape[1]
    out_dtype = jnp.dtype(y.dtype)
    if jnp.issubdtype(out_dtype, jnp.complexfloating):
        # TODO(synk): complex (true Hermitian adjoint) not supported in Mosaic.
        raise NotImplementedError("complex dtypes are not supported")

    # ---- Compute dtype ------------------------------------------------------
    if compute_dtype == "auto":
        if (out_dtype == jnp.float32 and min(M, N) >= 1024
                and _tpu_generation() >= 6):
            cdtype = jnp.dtype(jnp.bfloat16)     # review: bf16 operands on v6e/v7x
        else:
            cdtype = out_dtype
    elif compute_dtype is None:
        cdtype = out_dtype
    else:
        cdtype = jnp.dtype(compute_dtype)

    # Weights are small and VMEM-resident: cast once in the wrapper (no per-step
    # cast in-kernel).  y streams in its native dtype and is cast per tile.
    Bc = B.astype(cdtype)
    BHc = None if bh_is_transpose else BH.astype(cdtype)

    # ---- K tiling (lane-dense; never padded to a multiple of tk) ------------
    K_p = _round_up(max(K, 1), _LANE)
    y_in = y if K_p == K else jnp.pad(y, ((0, 0), (0, K_p - K)))

    c_size = cdtype.itemsize
    y_size = out_dtype.itemsize
    o_size = out_dtype.itemsize
    n_weights = 1 if bh_is_transpose else 2
    w_bytes = n_weights * M * N * c_size          # single-buffered weights

    def _tile_bytes(t):
        stream = 2 * (M * t * y_size + (N + M) * t * o_size)  # double-buffered I/O
        interm = (N * t * (4 + c_size)   # x_f32 + its cast copy
                  + M * t * 4            # recon (f32)
                  + M * t * 4)           # y cast / f32 view headroom
        if bh_is_transpose:
            interm += N * M * c_size     # in-kernel B^T temporary
        return stream + interm

    capacity = _vmem_capacity_bytes()
    budget = (capacity * 3) // 4         # ~96 MiB on v5e/v6e, ~48 MiB on v7x

    if tk is None:
        tk = min(K_p, 2048)              # fat tiles amortize per-step overhead
    tk = max(_LANE, min(_round_up(tk, _LANE), K_p))
    if K_p >= 2 * _LANE:
        # Keep >= 2 grid steps so v7x megacore has work for both TensorCores
        # and the pipeline actually overlaps DMA with compute.
        tk = min(tk, _round_up(K_p // 2, _LANE))
    while tk > _LANE and w_bytes + _tile_bytes(tk) > budget:
        tk -= _LANE

    grid = (pl.cdiv(K_p, tk),)
    need = w_bytes + _tile_bytes(tk)
    vmem_limit = int(min(max(need + (4 << 20), 32 << 20), capacity - (8 << 20)))

    out_shape = (
        jax.ShapeDtypeStruct((N, K_p), out_dtype),   # x
        jax.ShapeDtypeStruct((M, K_p), out_dtype),   # err
    )
    out_specs = (
        pl.BlockSpec((N, tk), lambda k: (0, k)),
        pl.BlockSpec((M, tk), lambda k: (0, k)),
    )
    cost = pl.CostEstimate(
        flops=4 * M * N * K_p + M * K_p,             # two matmuls + subtract
        transcendentals=0,
        bytes_accessed=int(n_weights * M * N * c_size
                           + M * K_p * y_size + (N + M) * K_p * o_size),
    )
    compiler_params = pltpu.CompilerParams(
        dimension_semantics=("parallel",),
        vmem_limit_bytes=vmem_limit,
    )

    def _weight_spec(shape, mode):
        if mode is None:
            return pl.BlockSpec(shape, lambda k: (0, 0))
        return pl.BlockSpec(shape, lambda k: (0, 0), pipeline_mode=mode)

    def _run(weight_mode):
        # TODO(synk): sweep pipeline_mode=pl.Buffered(3) on y / outputs if an
        # xprof trace still shows exposed DMA at tile boundaries.
        y_spec = pl.BlockSpec((M, tk), lambda k: (0, k))
        if bh_is_transpose:
            in_specs = [_weight_spec((M, N), weight_mode), y_spec]
            kernel = _agrid_h_kernel_shared
            operands = (Bc, y_in)
        else:
            in_specs = [_weight_spec((N, M), weight_mode),
                        _weight_spec((M, N), weight_mode),
                        y_spec]
            kernel = _agrid_h_kernel
            operands = (BHc, Bc, y_in)
        return pl.pallas_call(
            kernel,
            out_shape=out_shape,
            grid=grid,
            in_specs=in_specs,
            out_specs=out_specs,
            compiler_params=compiler_params,
            cost_estimate=cost,
        )(*operands)

    try:
        # Constant-index weights: single buffer (double buffering buys nothing).
        x_full, err_full = _run(pl.Buffered(1))
    except Exception:
        # JAX build without BlockSpec.pipeline_mode support: default buffering.
        x_full, err_full = _run(None)

    if K_p != K:
        x_full = x_full[:, :K]
        err_full = err_full[:, :K]
    return x_full, err_full


def agrid_h_ref(B, BH, y):
    """float64 numpy reference (precision-robust against MXU bf16 passes)."""
    Bn = np.asarray(B, np.float64)
    BHn = np.asarray(BH, np.float64)
    yn = np.asarray(y, np.float64)
    x = BHn @ yn
    return x, yn - Bn @ x


if __name__ == "__main__":
    key = jax.random.PRNGKey(0)
    kB, ky = jax.random.split(key)

    # Small shapes consistent with the module: B: (M, N), BH = B^H, y: (M, K).
    M, N, K = 32, 64, 8
    B = jax.random.normal(kB, (M, N), dtype=jnp.float32) / jnp.sqrt(N)
    BH = jnp.transpose(B)                    # real-valued -> adjoint is transpose
    y = jax.random.normal(ky, (M, K), dtype=jnp.float32)

    x_ref, err_ref = agrid_h_ref(B, BH, y)

    # Default path: separate BH and B shipped (general AgridH).
    x, err = agrid_h(B, BH, y)
    jax.block_until_ready((x, err))
    assert x.shape == (N, K) and err.shape == (M, K)
    assert x.dtype == y.dtype and err.dtype == y.dtype
    # Tolerances allow for MXU bf16-pass rounding of f32 matmuls.
    assert np.allclose(np.asarray(x), x_ref, atol=2e-2, rtol=2e-2), "x mismatch"
    assert np.allclose(np.asarray(err), err_ref, atol=2e-2, rtol=2e-2), "err mismatch"

    # Shared-weight path: BH is exactly B^T, ship only B.
    x2, err2 = agrid_h(B, None, y, bh_is_transpose=True)
    jax.block_until_ready((x2, err2))
    assert x2.shape == (N, K) and err2.shape == (M, K)
    assert np.allclose(np.asarray(x2), x_ref, atol=2e-2, rtol=2e-2), "x (shared) mismatch"
    assert np.allclose(np.asarray(err2), err_ref, atol=2e-2, rtol=2e-2), "err (shared) mismatch"

    print("KERNEL_OK")
</pallas_src>

<mosaic_0001>
module attributes {stable_mosaic.version = 11 : i64} {
  func.func @_agrid_h_kernel(%arg0: i32, %arg1: memref<64x32xf32, #tpu.memory_space<vmem>>, %arg2: memref<32x64xf32, #tpu.memory_space<vmem>>, %arg3: memref<32x128xf32, #tpu.memory_space<vmem>>, %arg4: memref<64x128xf32, #tpu.memory_space<vmem>>, %arg5: memref<32x128xf32, #tpu.memory_space<vmem>>) attributes {dimension_semantics = [#tpu.dimension_semantics<parallel>], iteration_bounds = array<i64: 1>, scalar_prefetch = 0 : i64, scratch_operands = 0 : i64, tpu.core_type = #tpu.core_type<tc>, window_params = [{pipeline_mode = #tpu.pipeline_mode<synchronous>, transform_indices = @transform_0, window_bounds = array<i64: 64, 32>}, {pipeline_mode = #tpu.pipeline_mode<synchronous>, transform_indices = @transform_1, window_bounds = array<i64: 32, 64>}, {transform_indices = @transform_2, window_bounds = array<i64: 32, 128>}, {transform_indices = @transform_3, window_bounds = array<i64: 64, 128>}, {transform_indices = @transform_4, window_bounds = array<i64: 32, 128>}]} {
    %c0 = arith.constant 0 : index
    %c0_0 = arith.constant 0 : index
    %0 = vector.load %arg1[%c0, %c0_0] : memref<64x32xf32, #tpu.memory_space<vmem>>, vector<64x32xf32>
    %c0_1 = arith.constant 0 : index
    %c0_2 = arith.constant 0 : index
    %1 = vector.load %arg2[%c0_1, %c0_2] : memref<32x64xf32, #tpu.memory_space<vmem>>, vector<32x64xf32>
    %c0_3 = arith.constant 0 : index
    %c0_4 = arith.constant 0 : index
    %2 = vector.load %arg3[%c0_3, %c0_4] : memref<32x128xf32, #tpu.memory_space<vmem>>, vector<32x128xf32>
    %cst = arith.constant dense<0.000000e+00> : vector<64x128xf32>
    %3 = tpu.matmul %0, %2, %cst {dimension_numbers = #tpu.dot_dimension_numbers<[1], [0], [0], [1], [0, 0, 1, 1], [], []>} : vector<64x32xf32>, vector<32x128xf32>, vector<64x128xf32> -> vector<64x128xf32>
    %c0_5 = arith.constant 0 : index
    %c0_6 = arith.constant 0 : index
    %4 = vector.load %arg4[%c0_5, %c0_6] : memref<64x128xf32, #tpu.memory_space<vmem>>, vector<64x128xf32>
    tpu.vector_store %arg4[%c0_5, %c0_6], %3 {strides = array<i32>} : memref<64x128xf32, #tpu.memory_space<vmem>>, vector<64x128xf32>,
    %cst_7 = arith.constant dense<0.000000e+00> : vector<32x128xf32>
    %5 = tpu.matmul %1, %3, %cst_7 {dimension_numbers = #tpu.dot_dimension_numbers<[1], [0], [0], [1], [0, 0, 1, 1], [], []>} : vector<32x64xf32>, vector<64x128xf32>, vector<32x128xf32> -> vector<32x128xf32>
    %6 = arith.subf %2, %5 : vector<32x128xf32>
    %c0_8 = arith.constant 0 : index
    %c0_9 = arith.constant 0 : index
    %7 = vector.load %arg5[%c0_8, %c0_9] : memref<32x128xf32, #tpu.memory_space<vmem>>, vector<32x128xf32>
    tpu.vector_store %arg5[%c0_8, %c0_9], %6 {strides = array<i32>} : memref<32x128xf32, #tpu.memory_space<vmem>>, vector<32x128xf32>,
    return
  }
  func.func @transform_0(%arg0: i32) -> (i32, i32) {
    %c0_i32 = arith.constant 0 : i32
    %c0_i32_0 = arith.constant 0 : i32
    %c0_i32_1 = arith.constant 0 : i32
    return %c0_i32, %c0_i32_0 : i32, i32
  }
  func.func @transform_1(%arg0: i32) -> (i32, i32) {
    %c0_i32 = arith.constant 0 : i32
    %c0_i32_0 = arith.constant 0 : i32
    %c0_i32_1 = arith.constant 0 : i32
    return %c0_i32, %c0_i32_0 : i32, i32
  }
  func.func @transform_2(%arg0: i32) -> (i32, i32) {
    %c0_i32 = arith.constant 0 : i32
    %c0_i32_0 = arith.constant 0 : i32
    return %c0_i32, %arg0 : i32, i32
  }
  func.func @transform_3(%arg0: i32) -> (i32, i32) {
    %c0_i32 = arith.constant 0 : i32
    %c0_i32_0 = arith.constant 0 : i32
    return %c0_i32, %arg0 : i32, i32
  }
  func.func @transform_4(%arg0: i32) -> (i32, i32) {
    %c0_i32 = arith.constant 0 : i32
    %c0_i32_0 = arith.constant 0 : i32
    return %c0_i32, %arg0 : i32, i32
  }
}

module attributes {stable_mosaic.version = 11 : i64} {
  func.func @_agrid_h_kernel(%arg0: i32, %arg1: memref<64x32xf32, #tpu.memory_space<vmem>>, %arg2: memref<32x64xf32, #tpu.memory_space<vmem>>, %arg3: memref<32x128xf32, #tpu.memory_space<vmem>>, %arg4: memref<64x128xf32, #tpu.memory_space<vmem>>, %arg5: memref<32x128xf32, #tpu.memory_space<vmem>>) attributes {dimension_semantics = [#tpu.dimension_semantics<parallel>], iteration_bounds = array<i64: 1>, scalar_prefetch = 0 : i64, scratch_operands = 0 : i64, tpu.core_type = #tpu.core_type<tc>, window_params = [{pipeline_mode = #tpu.pipeline_mode<synchronous>, transform_indices = @transform_0, window_bounds = array<i64: 64, 32>}, {pipeline_mode = #tpu.pipeline_mode<synchronous>, transform_indices = @transform_1, window_bounds = array<i64: 32, 64>}, {transform_indices = @transform_2, window_bounds = array<i64: 32, 128>}, {transform_indices = @transform_3, window_bounds = array<i64: 64, 128>}, {transform_indices = @transform_4, window_bounds = array<i64: 32, 128>}]} {
    %c0 = arith.constant 0 : index
    %c0_0 = arith.constant 0 : index
    %0 = vector.load %arg1[%c0, %c0_0] : memref<64x32xf32, #tpu.memory_space<vmem>>, vector<64x32xf32>
    %c0_1 = arith.constant 0 : index
    %c0_2 = arith.constant 0 : index
    %1 = vector.load %arg2[%c0_1, %c0_2] : memref<32x64xf32, #tpu.memory_space<vmem>>, vector<32x64xf32>
    %c0_3 = arith.constant 0 : index
    %c0_4 = arith.constant 0 : index
    %2 = vector.load %arg3[%c0_3, %c0_4] : memref<32x128xf32, #tpu.memory_space<vmem>>, vector<32x128xf32>
    %cst = arith.constant dense<0.000000e+00> : vector<64x128xf32>
    %3 = tpu.matmul %0, %2, %cst {dimension_numbers = #tpu.dot_dimension_numbers<[1], [0], [0], [1], [0, 0, 1, 1], [], []>} : vector<64x32xf32>, vector<32x128xf32>, vector<64x128xf32> -> vector<64x128xf32>
    %c0_5 = arith.constant 0 : index
    %c0_6 = arith.constant 0 : index
    %4 = vector.load %arg4[%c0_5, %c0_6] : memref<64x128xf32, #tpu.memory_space<vmem>>, vector<64x128xf32>
    tpu.vector_store %arg4[%c0_5, %c0_6], %3 {strides = array<i32>} : memref<64x128xf32, #tpu.memory_space<vmem>>, vector<64x128xf32>,
    %cst_7 = arith.constant dense<0.000000e+00> : vector<32x128xf32>
    %5 = tpu.matmul %1, %3, %cst_7 {dimension_numbers = #tpu.dot_dimension_numbers<[1], [0], [0], [1], [0, 0, 1, 1], [], []>} : vector<32x64xf32>, vector<64x128xf32>, vector<32x128xf32> -> vector<32x128xf32>
    %6 = arith.subf %2, %5 : vector<32x128xf32>
    %c0_8 = arith.constant 0 : index
    %c0_9 = arith.constant 0 : index
    %7 = vector.load %arg5[%c0_8, %c0_9] : memref<32x128xf32, #tpu.memory_space<vmem>>, vector<32x128xf32>
    tpu.vector_store %arg5[%c0_8, %c0_9], %6 {strides = array<i32>} : memref<32x128xf32, #tpu.memory_space<vmem>>, vector<32x128xf32>,
    return
  }
  func.func @transform_0(%arg0: i32) -> (i32, i32) {
    %c0_i32 = arith.constant 0 : i32
    %c0_i32_0 = arith.constant 0 : i32
    %c0_i32_1 = arith.constant 0 : i32
    return %c0_i32, %c0_i32_0 : i32, i32
  }
  func.func @transform_1(%arg0: i32) -> (i32, i32) {
    %c0_i32 = arith.constant 0 : i32
    %c0_i32_0 = arith.constant 0 : i32
    %c0_i32_1 = arith.constant 0 : i32
    return %c0_i32, %c0_i32_0 : i32, i32
  }
  func.func @transform_2(%arg0: i32) -> (i32, i32) {
    %c0_i32 = arith.constant 0 : i32
    %c0_i32_0 = arith.constant 0 : i32
    return %c0_i32, %arg0 : i32, i32
  }
  func.func @transform_3(%arg0: i32) -> (i32, i32) {
    %c0_i32 = arith.constant 0 : i32
    %c0_i32_0 = arith.constant 0 : i32
    return %c0_i32, %arg0 : i32, i32
  }
  func.func @transform_4(%arg0: i32) -> (i32, i32) {
    %c0_i32 = arith.constant 0 : i32
    %c0_i32_0 = arith.constant 0 : i32
    return %c0_i32, %arg0 : i32, i32
  }
}

</mosaic_0001>

<bundles_post_ra>
// kernel: tpu_custom_call.1
= control target key start
LH: loop header
LB: loop body
LE: loop exit
PB: predicated region body
PF: predicated region fallthrough
CT: control target
= control target key end

     0   :  { %10 = vsyncpa [#allocation3], 0  ;;  %vm34_vm0 = vcmask 261120   ;;  %s551_s0 = inlined_call_operand.vmem [shape: f32[64,32], index: 0, kind: input, shape index: {}]   ;;  %s552_s1 = inlined_call_operand.vmem [shape: f32[32,64], index: 1, kind: input, shape index: {}]   ;;  %s553_s2 = inlined_call_operand.vmem [shape: f32[32,128], index: 2, kind: input, shape index: {}]   ;;  %s554_s3 = inlined_call_operand.hbm [shape: f32[64,128], index: 3, kind: output, shape index: {0}]   ;;  %s555_s4 = inlined_call_operand.hbm [shape: f32[32,128], index: 4, kind: output, shape index: {1}]  }
   0x1   :  { %v468_v0 = vld [vmem:[%s553_s2 + $0x18] sm:$0xff]  ;;  %v473_v1 = vld [vmem:[%s553_s2 + $0x10] sm:$0xff]  ;;  %v18_v2 = vld [vmem:[%s551_s0] sm:$0xff] }
   0x2   :  { %346 = vmatprep.subr.mxu0 %v468_v0  ;;  %v483_v3 = vld [vmem:[%s553_s2 + $0x8] sm:$0xff]  ;;  %354 = vmatprep.mubr.msk.f32.mxu0 %vm34_vm0, %v18_v2  ;;  %v491_v4 = vld [vmem:[%s553_s2] sm:$0xff] }
   0x3   :  { %347 = vmatpush3.msra.mxu0 %v468_v0 }
   0x4   :  { %348 = vmatprep.subr.mxu0 %v473_v1 }
   0x5   :  { %349 = vmatpush3.msra.mxu0 %v473_v1 }
   0x6   :  { %11 = vsyncpa [#allocation5], 0  ;;  %350 = vmatprep.subr.mxu0 %v483_v3  ;;  %v19_v5 = vld [vmem:[%s551_s0 + $0x8] sm:$0xff]  ;;  %v20_v6 = vld [vmem:[%s551_s0 + $0x10] sm:$0xff]  ;;  %vm172_vm1 = vcmask 523264   ;;  %s436_s19 = smov [#allocation2]  }
   0x7   :  { %351 = vmatpush3.msra.mxu0 %v483_v3  ;;  %v21_v7 = vld [vmem:[%s551_s0 + $0x18] sm:$0xff]  ;;  %v22_v8 = vld [vmem:[%s551_s0 + $0x20] sm:$0xff]  ;;  %v23_v9 = vld [vmem:[%s551_s0 + $0x28] sm:$0xff]  ;;  %s283_s20 = sshll.u32 %s436_s19, 4  ;;  %s284_s20 = int_to_ptr.vmem [resolvable:$true] %s283_s20 }
   0x8   :  { %352 = vmatprep.subr.mxu0 %v491_v4  ;;  %v24_v10 = vld [vmem:[%s551_s0 + $0x30] sm:$0xff]  ;;  %v25_v11 = vld [vmem:[%s551_s0 + $0x38] sm:$0xff]  ;;  %v26_v12 = vld [vmem:[%s552_s1] sm:$0xff]  ;;  %s392_s21 = scalar_lea.vmem %s284_s20, 1024  ;;  %p397_p1 = scmp.lt.s32.totalorder %s284_s20, %s284_s20 }
   0x9   :  { %353 = vmatpush3.msra.mxu0 %v491_v4  ;;  %382 = vmatprep.mubr.msk.f32.mxu1 %vm172_vm1, %v26_v12  ;;  %v27_v21 = vld [vmem:[%s552_s1 + $0x8] sm:$0xff]  ;;  %v28_v22 = vld [vmem:[%s552_s1 + $0x10] sm:$0xff]  ;;  %v29_v23 = vld [vmem:[%s552_s1 + $0x18] sm:$0xff]  ;;  %p393_p0 = scmp.ne.s32.totalorder %s284_s20, %s392_s21  ;;  %p398_p2 = scmp.lt.s32.totalorder %s392_s21, %s392_s21 }
   0xa   :  { %355 = vmatmul.mubr.msk.f32.vlgmr.msra.gmra.mxu0 %vm34_vm0, %v19_v5 }
   0xb   :  { %357 = vmatprep.mubr.msk.f32.mxu0 %vm34_vm0, %v20_v6  ;;  %p399_p3 = por %p398_p2, %p397_p1 }
   0xd   :  { %p400_p4 = pnand %p399_p3, %p393_p0 }
   0xe   :  { %358 = vmatmul.mubr.msk.f32.gmra.mxu0 %vm34_vm0, %v21_v7 }
   0xf   :  { %360 = vmatprep.mubr.msk.f32.mxu0 %vm34_vm0, %v22_v8 }
  0x12   :  { %361 = vmatmul.mubr.msk.f32.gmra.mxu0 %vm34_vm0, %v23_v9 }
  0x13   :  { %363 = vmatprep.mubr.msk.f32.mxu0 %vm34_vm0, %v24_v10 }
  0x16   :  { %364 = vmatmul.mubr.msk.f32.gmra.mxu0 %vm34_vm0, %v25_v11 }
  0xca   :  { %v356_v13 = vpop.f32.mrf.mxu0 }
  0xcb   :  { %165 = vst [vmem:[#allocation2 + $0x8] sm:$0xff] %v356_v13 }
  0xcc   :  { %v125_v14 = vpop.f32.mrf.mxu0 }
  0xcd   :  { %164 = vst [vmem:[#allocation2] sm:$0xff] %v125_v14 }
  0xce   :  { %v359_v15 = vpop.f32.mrf.mxu0 }
  0xcf   :  { %167 = vst [vmem:[#allocation2 + $0x18] sm:$0xff] %v359_v15 }
  0xd0   :  { %v135_v16 = vpop.f32.mrf.mxu0 }
  0xd1   :  { %166 = vst [vmem:[#allocation2 + $0x10] sm:$0xff] %v135_v16 }
  0xd2   :  { %v362_v17 = vpop.f32.mrf.mxu0 }
  0xd3   :  { %169 = vst [vmem:[#allocation2 + $0x28] sm:$0xff] %v362_v17 }
  0xd4   :  { %v145_v18 = vpop.f32.mrf.mxu0 }
  0xd5   :  { %168 = vst [vmem:[#allocation2 + $0x20] sm:$0xff] %v145_v18 }
  0xd6   :  { %v365_v19 = vpop.f32.mrf.mxu0 }
  0xd7   :  { %171 = vst [vmem:[#allocation2 + $0x38] sm:$0xff] %v365_v19  ;;  %366 = vmatprep.subr.mxu1 %v365_v19 }
  0xd8   :  { %v155_v20 = vpop.f32.mrf.mxu0  ;;  %367 = vmatpush3.msra.mxu1 %v365_v19 }
  0xd9   :  { %170 = vst [vmem:[#allocation2 + $0x30] sm:$0xff] %v155_v20  ;;  %368 = vmatprep.subr.mxu1 %v155_v20 }
  0xda   :  { %369 = vmatpush3.msra.mxu1 %v155_v20 }
  0xdb   :  { %370 = vmatprep.subr.mxu1 %v362_v17 }
  0xdc   :  { %371 = vmatpush3.msra.mxu1 %v362_v17 }
  0xdd   :  { %372 = vmatprep.subr.mxu1 %v145_v18 }
  0xde   :  { %373 = vmatpush3.msra.mxu1 %v145_v18 }
  0xdf   :  { %374 = vmatprep.subr.mxu1 %v359_v15 }
  0xe0   :  { %375 = vmatpush3.msra.mxu1 %v359_v15 }
  0xe1   :  { %376 = vmatprep.subr.mxu1 %v135_v16 }
  0xe2   :  { %377 = vmatpush3.msra.mxu1 %v135_v16 }
  0xe3   :  { %378 = vmatprep.subr.mxu1 %v356_v13 }
  0xe4   :  { %379 = vmatpush3.msra.mxu1 %v356_v13 }
  0xe5   :  { %380 = vmatprep.subr.mxu1 %v125_v14 }
  0xe6   :  { %381 = vmatpush3.msra.mxu1 %v125_v14 }
  0xe7   :  { %383 = vmatmul.mubr.msk.f32.vlgmr.msra.gmra.mxu1 %vm172_vm1, %v27_v21 }
  0xe8   :  { %385 = vmatprep.mubr.msk.f32.mxu1 %vm172_vm1, %v28_v22 }
  0xeb   :  { %386 = vmatmul.mubr.msk.f32.gmra.mxu1 %vm172_vm1, %v29_v23 }
  0xec   :  { %403 = shalt.err (!%p400_p4)
}
  0xed   :  { %s437_s22 = smov 128   ;;  %s438_s23 = smov 8  }
  0xee   :  { %289 = dma.vmem_to_hbm [thread:$0]  %s284_s20, 1024, %s554_s3, [#allocation3], %s437_s22, %s437_s22, %s438_s23  }
  0xef   :  { %s439_s1 = smov [#allocation4]  }
  0xf0   :  { %s295_s26 = sshll.u32 %s439_s1, 4  ;;  %s296_s26 = int_to_ptr.vmem [resolvable:$true] %s295_s26 }
  0xf1   :  { %s412_s3 = scalar_lea.vmem %s296_s26, 512  ;;  %p417_p6 = scmp.lt.s32.totalorder %s296_s26, %s296_s26 }
  0xf2   :  { %p413_p5 = scmp.ne.s32.totalorder %s296_s26, %s412_s3  ;;  %p418_p7 = scmp.lt.s32.totalorder %s412_s3, %s412_s3 }
  0xf4   :  { %p419_p8 = por %p418_p7, %p417_p6 }
  0xf6   :  { %p420_p9 = pnand %p419_p8, %p413_p5 }
 0x1a7   :  { %v384_v24 = vpop.f32.mrf.mxu1 }
 0x1a8   :  { %v271_v25 = vsub.f32 %v483_v3, %v384_v24 }
 0x1a9   :  { %v251_v26 = vpop.f32.mrf.mxu1 }
 0x1aa   :  { %275 = vst [vmem:[#allocation4 + $0x8] sm:$0xff] %v271_v25  ;;  %v270_v27 = vsub.f32 %v491_v4, %v251_v26 }
 0x1ab   :  { %v387_v28 = vpop.f32.mrf.mxu1 }
 0x1ac   :  { %274 = vst [vmem:[#allocation4] sm:$0xff] %v270_v27  ;;  %v273_v29 = vsub.f32 %v468_v0, %v387_v28 }
 0x1ad   :  { %v261_v30 = vpop.f32.mrf.mxu1 }
 0x1ae   :  { %277 = vst [vmem:[#allocation4 + $0x18] sm:$0xff] %v273_v29  ;;  %v272_v31 = vsub.f32 %v473_v1, %v261_v30 }
 0x1b0   :  { %276 = vst [vmem:[#allocation4 + $0x10] sm:$0xff] %v272_v31 }
 0x1b1   :  { %423 = shalt.err (!%p420_p9)
}
 0x1b2   :  { %301 = dma.vmem_to_hbm [thread:$0]  %s296_s26, 512, %s555_s4, [#allocation5], %s437_s22, %s437_s22, %s438_s23  }
 0x1b3   :  { %432 = dma.done.wait [#allocation3], 1024  }
 0x1b4   :  { %433 = vsyncadd [#allocation3], 4294966272 }
 0x1b5   :  { %434 = dma.done.wait [#allocation5], 512  }
 0x1b6   :  { %435 = vsyncadd [#allocation5], 4294966784 }
 0x1b7   :  { %308 = vsyncpa [#allocation3], 1 }
 0x1b8   :  { %309 = vsyncpa [#allocation5], 1 }

// kernel: tpu_custom_call.1
= control target key start
LH: loop header
LB: loop body
LE: loop exit
PB: predicated region body
PF: predicated region fallthrough
CT: control target
= control target key end

     0   :  { %10 = vsyncpa [#allocation3], 0  ;;  %vm34_vm0 = vcmask 261120   ;;  %s551_s0 = inlined_call_operand.vmem [shape: f32[64,32], index: 0, kind: input, shape index: {}]   ;;  %s552_s1 = inlined_call_operand.vmem [shape: f32[32,64], index: 1, kind: input, shape index: {}]   ;;  %s553_s2 = inlined_call_operand.vmem [shape: f32[32,128], index: 2, kind: input, shape index: {}]   ;;  %s554_s3 = inlined_call_operand.hbm [shape: f32[64,128], index: 3, kind: output, shape index: {0}]   ;;  %s555_s4 = inlined_call_operand.hbm [shape: f32[32,128], index: 4, kind: output, shape index: {1}]  }
   0x1   :  { %v468_v0 = vld [vmem:[%s553_s2 + $0x18] sm:$0xff]  ;;  %v473_v1 = vld [vmem:[%s553_s2 + $0x10] sm:$0xff]  ;;  %v18_v2 = vld [vmem:[%s551_s0] sm:$0xff] }
   0x2   :  { %346 = vmatprep.subr.mxu0 %v468_v0  ;;  %v483_v3 = vld [vmem:[%s553_s2 + $0x8] sm:$0xff]  ;;  %354 = vmatprep.mubr.msk.f32.mxu0 %vm34_vm0, %v18_v2  ;;  %v491_v4 = vld [vmem:[%s553_s2] sm:$0xff] }
   0x3   :  { %347 = vmatpush3.msra.mxu0 %v468_v0 }
   0x4   :  { %348 = vmatprep.subr.mxu0 %v473_v1 }
   0x5   :  { %349 = vmatpush3.msra.mxu0 %v473_v1 }
   0x6   :  { %11 = vsyncpa [#allocation5], 0  ;;  %350 = vmatprep.subr.mxu0 %v483_v3  ;;  %v19_v5 = vld [vmem:[%s551_s0 + $0x8] sm:$0xff]  ;;  %v20_v6 = vld [vmem:[%s551_s0 + $0x10] sm:$0xff]  ;;  %vm172_vm1 = vcmask 523264   ;;  %s436_s19 = smov [#allocation2]  }
   0x7   :  { %351 = vmatpush3.msra.mxu0 %v483_v3  ;;  %v21_v7 = vld [vmem:[%s551_s0 + $0x18] sm:$0xff]  ;;  %v22_v8 = vld [vmem:[%s551_s0 + $0x20] sm:$0xff]  ;;  %v23_v9 = vld [vmem:[%s551_s0 + $0x28] sm:$0xff]  ;;  %s283_s20 = sshll.u32 %s436_s19, 4  ;;  %s284_s20 = int_to_ptr.vmem [resolvable:$true] %s283_s20 }
   0x8   :  { %352 = vmatprep.subr.mxu0 %v491_v4  ;;  %v24_v10 = vld [vmem:[%s551_s0 + $0x30] sm:$0xff]  ;;  %v25_v11 = vld [vmem:[%s551_s0 + $0x38] sm:$0xff]  ;;  %v26_v12 = vld [vmem:[%s552_s1] sm:$0xff]  ;;  %s392_s21 = scalar_lea.vmem %s284_s20, 1024  ;;  %p397_p1 = scmp.lt.s32.totalorder %s284_s20, %s284_s20 }
   0x9   :  { %353 = vmatpush3.msra.mxu0 %v491_v4  ;;  %382 = vmatprep.mubr.msk.f32.mxu1 %vm172_vm1, %v26_v12  ;;  %v27_v21 = vld [vmem:[%s552_s1 + $0x8] sm:$0xff]  ;;  %v28_v22 = vld [vmem:[%s552_s1 + $0x10] sm:$0xff]  ;;  %v29_v23 = vld [vmem:[%s552_s1 + $0x18] sm:$0xff]  ;;  %p393_p0 = scmp.ne.s32.totalorder %s284_s20, %s392_s21  ;;  %p398_p2 = scmp.lt.s32.totalorder %s392_s21, %s392_s21 }
   0xa   :  { %355 = vmatmul.mubr.msk.f32.vlgmr.msra.gmra.mxu0 %vm34_vm0, %v19_v5 }
   0xb   :  { %357 = vmatprep.mubr.msk.f32.mxu0 %vm34_vm0, %v20_v6  ;;  %p399_p3 = por %p398_p2, %p397_p1 }
   0xd   :  { %p400_p4 = pnand %p399_p3, %p393_p0 }
   0xe   :  { %358 = vmatmul.mubr.msk.f32.gmra.mxu0 %vm34_vm0, %v21_v7 }
   0xf   :  { %360 = vmatprep.mubr.msk.f32.mxu0 %vm34_vm0, %v22_v8 }
  0x12   :  { %361 = vmatmul.mubr.msk.f32.gmra.mxu0 %vm34_vm0, %v23_v9 }
  0x13   :  { %363 = vmatprep.mubr.msk.f32.mxu0 %vm34_vm0, %v24_v10 }
  0x16   :  { %364 = vmatmul.mubr.msk.f32.gmra.mxu0 %vm34_vm0, %v25_v11 }
  0xca   :  { %v356_v13 = vpop.f32.mrf.mxu0 }
  0xcb   :  { %165 = vst [vmem:[#allocation2 + $0x8] sm:$0xff] %v356_v13 }
  0xcc   :  { %v125_v14 = vpop.f32.mrf.mxu0 }
  0xcd   :  { %164 = vst [vmem:[#allocation2] sm:$0xff] %v125_v14 }
  0xce   :  { %v359_v15 = vpop.f32.mrf.mxu0 }
  0xcf   :  { %167 = vst [vmem:[#allocation2 + $0x18] sm:$0xff] %v359_v15 }
  0xd0   :  { %v135_v16 = vpop.f32.mrf.mxu0 }
  0xd1   :  { %166 = vst [vmem:[#allocation2 + $0x10] sm:$0xff] %v135_v16 }
  0xd2   :  { %v362_v17 = vpop.f32.mrf.mxu0 }
  0xd3   :  { %169 = vst [vmem:[#allocation2 + $0x28] sm:$0xff] %v362_v17 }
  0xd4   :  { %v145_v18 = vpop.f32.mrf.mxu0 }
  0xd5   :  { %168 = vst [vmem:[#allocation2 + $0x20] sm:$0xff] %v145_v18 }
  0xd6   :  { %v365_v19 = vpop.f32.mrf.mxu0 }
  0xd7   :  { %171 = vst [vmem:[#allocation2 + $0x38] sm:$0xff] %v365_v19  ;;  %366 = vmatprep.subr.mxu1 %v365_v19 }
  0xd8   :  { %v155_v20 = vpop.f32.mrf.mxu0  ;;  %367 = vmatpush3.msra.mxu1 %v365_v19 }
  0xd9   :  { %170 = vst [vmem:[#allocation2 + $0x30] sm:$0xff] %v155_v20  ;;  %368 = vmatprep.subr.mxu1 %v155_v20 }
  0xda   :  { %369 = vmatpush3.msra.mxu1 %v155_v20 }
  0xdb   :  { %370 = vmatprep.subr.mxu1 %v362_v17 }
  0xdc   :  { %371 = vmatpush3.msra.mxu1 %v362_v17 }
  0xdd   :  { %372 = vmatprep.subr.mxu1 %v145_v18 }
  0xde   :  { %373 = vmatpush3.msra.mxu1 %v145_v18 }
  0xdf   :  { %374 = vmatprep.subr.mxu1 %v359_v15 }
  0xe0   :  { %375 = vmatpush3.msra.mxu1 %v359_v15 }
  0xe1   :  { %376 = vmatprep.subr.mxu1 %v135_v16 }
  0xe2   :  { %377 = vmatpush3.msra.mxu1 %v135_v16 }
  0xe3   :  { %378 = vmatprep.subr.mxu1 %v356_v13 }
  0xe4   :  { %379 = vmatpush3.msra.mxu1 %v356_v13 }
  0xe5   :  { %380 = vmatprep.subr.mxu1 %v125_v14 }
  0xe6   :  { %381 = vmatpush3.msra.mxu1 %v125_v14 }
  0xe7   :  { %383 = vmatmul.mubr.msk.f32.vlgmr.msra.gmra.mxu1 %vm172_vm1, %v27_v21 }
  0xe8   :  { %385 = vmatprep.mubr.msk.f32.mxu1 %vm172_vm1, %v28_v22 }
  0xeb   :  { %386 = vmatmul.mubr.msk.f32.gmra.mxu1 %vm172_vm1, %v29_v23 }
  0xec   :  { %403 = shalt.err (!%p400_p4)
}
  0xed   :  { %s437_s22 = smov 128   ;;  %s438_s23 = smov 8  }
  0xee   :  { %289 = dma.vmem_to_hbm [thread:$0]  %s284_s20, 1024, %s554_s3, [#allocation3], %s437_s22, %s437_s22, %s438_s23  }
  0xef   :  { %s439_s1 = smov [#allocation4]  }
  0xf0   :  { %s295_s26 = sshll.u32 %s439_s1, 4  ;;  %s296_s26 = int_to_ptr.vmem [resolvable:$true] %s295_s26 }
  0xf1   :  { %s412_s3 = scalar_lea.vmem %s296_s26, 512  ;;  %p417_p6 = scmp.lt.s32.totalorder %s296_s26, %s296_s26 }
  0xf2   :  { %p413_p5 = scmp.ne.s32.totalorder %s296_s26, %s412_s3  ;;  %p418_p7 = scmp.lt.s32.totalorder %s412_s3, %s412_s3 }
  0xf4   :  { %p419_p8 = por %p418_p7, %p417_p6 }
  0xf6   :  { %p420_p9 = pnand %p419_p8, %p413_p5 }
 0x1a7   :  { %v384_v24 = vpop.f32.mrf.mxu1 }
 0x1a8   :  { %v271_v25 = vsub.f32 %v483_v3, %v384_v24 }
 0x1a9   :  { %v251_v26 = vpop.f32.mrf.mxu1 }
 0x1aa   :  { %275 = vst [vmem:[#allocation4 + $0x8] sm:$0xff] %v271_v25  ;;  %v270_v27 = vsub.f32 %v491_v4, %v251_v26 }
 0x1ab   :  { %v387_v28 = vpop.f32.mrf.mxu1 }
 0x1ac   :  { %274 = vst [vmem:[#allocation4] sm:$0xff] %v270_v27  ;;  %v273_v29 = vsub.f32 %v468_v0, %v387_v28 }
 0x1ad   :  { %v261_v30 = vpop.f32.mrf.mxu1 }
 0x1ae   :  { %277 = vst [vmem:[#allocation4 + $0x18] sm:$0xff] %v273_v29  ;;  %v272_v31 = vsub.f32 %v473_v1, %v261_v30 }
 0x1b0   :  { %276 = vst [vmem:[#allocation4 + $0x10] sm:$0xff] %v272_v31 }
 0x1b1   :  { %423 = shalt.err (!%p420_p9)
}
 0x1b2   :  { %301 = dma.vmem_to_hbm [thread:$0]  %s296_s26, 512, %s555_s4, [#allocation5], %s437_s22, %s437_s22, %s438_s23  }
 0x1b3   :  { %432 = dma.done.wait [#allocation3], 1024  }
 0x1b4   :  { %433 = vsyncadd [#allocation3], 4294966272 }
 0x1b5   :  { %434 = dma.done.wait [#allocation5], 512  }
 0x1b6   :  { %435 = vsyncadd [#allocation5], 4294966784 }
 0x1b7   :  { %308 = vsyncpa [#allocation3], 1 }
 0x1b8   :  { %309 = vsyncpa [#allocation5], 1 }

</bundles_post_ra>
